<compile_context>
chip_gen: v5e
topology: v5e:2x2
jax: 0.10.0
libtpu: 0.0.40
codegen_flags: <defaults>
</compile_context>

<pallas_src>
import jax
import jax.numpy as jnp
from jax.experimental import pallas as pl
from jax.experimental.pallas import tpu as pltpu


def _norm_kernel(x_ref, o_ref):
    # x_ref / o_ref: (C_BLK, HW) tiles in VMEM.
    x = x_ref[...].astype(jnp.float32)
    hw = x.shape[-1]

    # per-channel mean over the lane (spatial) axis
    mean = jnp.sum(x, axis=-1, keepdims=True) * (1.0 / hw)

    # unbiased variance (torch.std default: ddof=1); two-pass form to avoid
    # catastrophic cancellation when |mean| >> std.
    diff = x - mean
    var = jnp.sum(diff * diff, axis=-1, keepdims=True) * (1.0 / (hw - 1))
    std = jnp.sqrt(var)

    # one exact reciprocal per channel + HW multiplies instead of HW divides.
    # approx=False: the EUP approx reciprocal (~2^-12 rel err) would blow the
    # 1e-5 tolerance on the final divide-by-std.
    inv = pl.reciprocal(std + 1e-7, approx=False)

    # Re-read x_ref for the normalize pass so the tile-sized `diff` temp is
    # dead after the reduction above (frees ~one block of VMEM per step).
    o_ref[...] = ((x_ref[...].astype(jnp.float32) - mean) * inv).astype(o_ref.dtype)


def _choose_c_block(c, hw, bytes_per_elem=4):
    """Pick the channel-block size.

    Target ~6 MiB per tile: with input + output each double-buffered that is
    ~24 MiB of live buffers plus small transients, comfortably inside the
    48 MiB VMEM limit requested below (and v7x's 64 MiB physical VMEM), while
    still large enough to amortize the ~0.35 us per-grid-step overhead.
    """
    if c <= 8:
        # block sublane dim equals the full array dim -> always legal.
        return c

    budget_per_buffer = 6 * 1024 * 1024
    rows = max(budget_per_buffer // (hw * bytes_per_elem), 8)
    rows = max((rows // 8) * 8, 8)          # keep sublane-aligned (f32: 8 rows)

    # Cap so the parallel grid has >=2 steps: on v7x the two TensorCores share
    # the grid axis, so a single giant block would leave one core idle.
    half = ((pl.cdiv(c, 2) + 7) // 8) * 8
    rows = min(rows, max(8, half))

    c_pad8 = ((c + 7) // 8) * 8
    return min(rows, c_pad8)


def norm_layer(x):
    """x: (1, C, H, W) float32 -> (1, C, H, W) normalized per channel."""
    b, c, h, w = x.shape
    assert b == 1
    hw = h * w
    # torch.std with a single element returns NaN; we require hw > 1 so the
    # static 1/(hw-1) factor is well defined.
    assert hw > 1, "normLayer requires h*w > 1 (unbiased std is undefined)"

    x2d = x.reshape(c, hw)

    c_blk = _choose_c_block(c, hw)
    # TODO(synk): if a single channel row block (8 * hw * 4B) ever exceeds the
    # VMEM budget (huge spatial sizes), add a reduction grid axis over HW with
    # sum / sum-of-squares scratch accumulators and a second normalize pass.
    grid = (pl.cdiv(c, c_blk),)

    # NOTE: input_output_aliases={0: 0} would trim the extra HBM allocation if
    # the caller donates x; left off here because the wrapper keeps x live.
    out2d = pl.pallas_call(
        _norm_kernel,
        out_shape=jax.ShapeDtypeStruct((c, hw), x.dtype),
        grid=grid,
        in_specs=[pl.BlockSpec((c_blk, hw), lambda i: (i, 0))],
        out_specs=pl.BlockSpec((c_blk, hw), lambda i: (i, 0)),
        compiler_params=pltpu.CompilerParams(
            dimension_semantics=("parallel",),
            vmem_limit_bytes=48 * 1024 * 1024,
        ),
    )(x2d)

    return out2d.reshape(b, c, h, w)


if __name__ == "__main__":
    key = jax.random.PRNGKey(0)
    # small shape consistent with the module's forward: batch must be 1
    x = jax.random.normal(key, (1, 4, 16, 16), dtype=jnp.float32) * 3.0 + 1.5

    out = norm_layer(x)
    jax.block_until_ready(out)

    # in-script sanity check against a pure-JAX reference
    c = x.shape[1]
    xf = x.reshape(c, -1)
    mean = xf.mean(-1)
    std = jnp.sqrt(jnp.sum((xf - mean[:, None]) ** 2, axis=-1) / (xf.shape[-1] - 1))
    ref = (x - mean.reshape(1, c, 1, 1)) / (std + 1e-7).reshape(1, c, 1, 1)
    assert jnp.allclose(out, ref, atol=1e-5, rtol=1e-5)

    print("KERNEL_OK")
</pallas_src>

<mosaic_0001>
module attributes {stable_mosaic.version = 11 : i64} {
  func.func @_norm_kernel(%arg0: i32, %arg1: memref<4x256xf32, #tpu.memory_space<vmem>>, %arg2: memref<4x256xf32, #tpu.memory_space<vmem>>) attributes {dimension_semantics = [#tpu.dimension_semantics<parallel>], iteration_bounds = array<i64: 1>, scalar_prefetch = 0 : i64, scratch_operands = 0 : i64, tpu.core_type = #tpu.core_type<tc>, window_params = [{transform_indices = @transform_0, window_bounds = array<i64: 4, 256>}, {transform_indices = @transform_1, window_bounds = array<i64: 4, 256>}]} {
    %c0 = arith.constant 0 : index
    %c0_0 = arith.constant 0 : index
    %0 = vector.load %arg1[%c0, %c0_0] : memref<4x256xf32, #tpu.memory_space<vmem>>, vector<4x256xf32>
    %cst = arith.constant dense<0.000000e+00> : vector<4xf32>
    %1 = vector.multi_reduction <add>, %0, %cst [1] : vector<4x256xf32> to vector<4xf32>
    %2 = vector.shape_cast %1 : vector<4xf32> to vector<4x1xf32>
    %cst_1 = arith.constant 3.906250e-03 : f32
    %3 = vector.broadcast %cst_1 : f32 to vector<4x1xf32>
    %4 = arith.mulf %2, %3 : vector<4x1xf32>
    %5 = vector.broadcast %4 : vector<4x1xf32> to vector<4x256xf32>
    %6 = arith.subf %0, %5 : vector<4x256xf32>
    %7 = arith.mulf %6, %6 : vector<4x256xf32>
    %cst_2 = arith.constant dense<0.000000e+00> : vector<4xf32>
    %8 = vector.multi_reduction <add>, %7, %cst_2 [1] : vector<4x256xf32> to vector<4xf32>
    %9 = vector.shape_cast %8 : vector<4xf32> to vector<4x1xf32>
    %cst_3 = arith.constant 0.00392156886 : f32
    %10 = vector.broadcast %cst_3 : f32 to vector<4x1xf32>
    %11 = arith.mulf %9, %10 : vector<4x1xf32>
    %12 = math.sqrt %11 : vector<4x1xf32>
    %cst_4 = arith.constant 1.000000e-07 : f32
    %13 = vector.broadcast %cst_4 : f32 to vector<4x1xf32>
    %14 = arith.addf %12, %13 : vector<4x1xf32>
    %15 = tpu.reciprocal %14 : vector<4x1xf32> -> vector<4x1xf32>
    %c0_5 = arith.constant 0 : index
    %c0_6 = arith.constant 0 : index
    %16 = vector.load %arg1[%c0_5, %c0_6] : memref<4x256xf32, #tpu.memory_space<vmem>>, vector<4x256xf32>
    %17 = vector.broadcast %4 : vector<4x1xf32> to vector<4x256xf32>
    %18 = arith.subf %16, %17 : vector<4x256xf32>
    %19 = vector.broadcast %15 : vector<4x1xf32> to vector<4x256xf32>
    %20 = arith.mulf %18, %19 : vector<4x256xf32>
    %c0_7 = arith.constant 0 : index
    %c0_8 = arith.constant 0 : index
    %21 = vector.load %arg2[%c0_7, %c0_8] : memref<4x256xf32, #tpu.memory_space<vmem>>, vector<4x256xf32>
    tpu.vector_store %arg2[%c0_7, %c0_8], %20 {strides = array<i32>} : memref<4x256xf32, #tpu.memory_space<vmem>>, vector<4x256xf32>,
    return
  }
  func.func @transform_0(%arg0: i32) -> (i32, i32) {
    %c0_i32 = arith.constant 0 : i32
    %c0_i32_0 = arith.constant 0 : i32
    return %arg0, %c0_i32 : i32, i32
  }
  func.func @transform_1(%arg0: i32) -> (i32, i32) {
    %c0_i32 = arith.constant 0 : i32
    %c0_i32_0 = arith.constant 0 : i32
    return %arg0, %c0_i32 : i32, i32
  }
}

</mosaic_0001>

<bundles_post_ra>
// kernel: tpu_custom_call.1
= control target key start
LH: loop header
LB: loop body
LE: loop exit
PB: predicated region body
PF: predicated region fallthrough
CT: control target
= control target key end

     0   :  { %6 = vsyncpa [#allocation3], 0  ;;  %s191_s0 = inlined_call_operand.hbm [shape: f32[4,256], index: 0, kind: input, shape index: {}]   ;;  %s192_s1 = inlined_call_operand.hbm [shape: f32[4,256], index: 1, kind: output, shape index: {}]  }
   0x1   :  { %7 = vsyncpa [#allocation4], 0  ;;  %s13_s8 = sshll.u32 %s191_s0, 4  ;;  %s168_s9 = smov [#allocation2]   ;;  %s14_s8 = int_to_ptr.hbm [resolvable:$true] %s13_s8 }
   0x2   :  { %s15_s10 = sshll.u32 %s168_s9, 4  ;;  %s16_s10 = int_to_ptr.vmem [resolvable:$true] %s15_s10 }
   0x3   :  { %18 = dma.hbm_to_vmem [thread:$0]  %s14_s8, 128, %s16_s10, [#allocation3]  }
   0x4   :  { %164 = dma.done.wait [#allocation3], 128  }
   0x5   :  { %165 = vsyncadd [#allocation3], 4294967168  ;;  %v23_v0 = vld [vmem:[#allocation2] sm:$0xff]  ;;  %vm30_vm0 = vcmask 1043456   ;;  %v169_v6 = vmov 839922192  }
   0x6   :  { %25 = vst [vmem:[#allocation1] ss:$2 sm:$0xff] %v23_v0  ;;  %v39_v7 = vunpack.c.l.s4 %v169_v6  ;;  %s170_s0 = smov [#allocation5]   ;;  %s99_s14 = sshll.u32 %s192_s1, 4  ;;  %s100_s14 = int_to_ptr.hbm [resolvable:$true] %s99_s14 }
   0x7   :  { %s97_s11 = sshll.u32 %s170_s0, 4  ;;  %s98_s11 = int_to_ptr.vmem [resolvable:$true] %s97_s11 }
   0x8   :  { %v40_v8 = vunpack.c.0.s8 %v39_v7 }
   0xd   :  { %v26_v1 = vld.sshfl [vmem:[#allocation1] sm:$0xff pattern:$0x75316420]  ;;  %v27_v2 = vld.sshfl [vmem:[#allocation1 + $0x8] sm:$0xff pattern:$0x75316420] }
   0xe   :  { %v31_v3 = vsel %vm30_vm0, %v26_v1, 0.0  ;;  %v32_v4 = vsel %vm30_vm0, %v27_v2, 0.0 }
   0xf   :  { %v33_v5 = vadd.f32 %v32_v4, %v31_v3 }
  0x11   :  { %34 = vadd.xlane.f32.xlu0 %v33_v5 }
  0x84   :  { %v35_v9 = vpop.xlane.xlu0 %34 }
  0x85   :  { %v36_v10 = vmul.f32 0.00390625, %v35_v9 }
  0x87   :  { %v41_v11 = vperm.slane %v36_v10, %v40_v8 }
  0x89   :  { %v43_v12 = vsub.f32 %v23_v0, %v41_v11 }
  0x8b   :  { %v44_v13 = vmul.f32 %v43_v12, %v43_v12 }
  0x8d   :  { %46 = vst [vmem:[#allocation1] ss:$2 sm:$0xff] %v44_v13 }
  0x94   :  { %v47_v14 = vld.sshfl [vmem:[#allocation1] sm:$0xff pattern:$0x75316420]  ;;  %v48_v15 = vld.sshfl [vmem:[#allocation1 + $0x8] sm:$0xff pattern:$0x75316420] }
  0x95   :  { %v51_v16 = vsel %vm30_vm0, %v47_v14, 0.0  ;;  %v52_v17 = vsel %vm30_vm0, %v48_v15, 0.0 }
  0x96   :  { %v53_v18 = vadd.f32 %v52_v17, %v51_v16 }
  0x98   :  { %54 = vadd.xlane.f32.xlu0 %v53_v18 }
 0x10b   :  { %v55_v19 = vpop.xlane.xlu0 %54 }
 0x10c   :  { %v56_v20 = vmul.f32 0.003921569, %v55_v19 }
 0x10e   :  { %112 = vrsqrt.f32 %v56_v20  ;;  %vm64_vm1 = vcmp.eq.f32.partialorder %v56_v20, inf  ;;  %v67_v28 = vand.u32 2147483648, %v56_v20  ;;  %vm66_vm2 = vcmp.eq.f32.partialorder %v56_v20, 0.0 }
 0x114   :  { %v113_v21 = vpop.eup %112 }
 0x115   :  { %v58_v22 = vmul.f32 %v113_v21, %v56_v20 }
 0x117   :  { %v59_v23 = vmul.f32 %v113_v21, %v58_v22 }
 0x119   :  { %v60_v24 = vmul.f32 0.5, %v59_v23 }
 0x11b   :  { %v61_v25 = vsub.f32 1.5, %v60_v24 }
 0x11d   :  { %v62_v26 = vmul.f32 %v113_v21, %v61_v25 }
 0x11f   :  { %v63_v27 = vmul.f32 %v62_v26, %v56_v20 }
 0x121   :  { %v65_v29 = vsel %vm64_vm1, %v56_v20, %v63_v27 }
 0x122   :  { %v68_v30 = vsel %vm66_vm2, %v67_v28, %v65_v29 }
 0x123   :  { %v69_v31 = vadd.f32 1e-07, %v68_v30 }
 0x125   :  { %114 = vrcp.f32 %v69_v31  ;;  %v81_v35 = vand.u32 2147483648, %v69_v31  ;;  %v79_v37 = vand.u32 2147483647, %v69_v31  ;;  %vm75_vm4 = vweird.f32 %v69_v31 }
 0x127   :  { %v82_v39 = vor.u32 1.1754944e-38, %v81_v35  ;;  %vm80_vm6 = vcmp.eq.f32.partialorder %v79_v37, 8.507059e+37 }
 0x12b   :  { %v115_v32 = vpop.eup %114 }
 0x12c   :  { %v71_v33 = vmul.f32 %v115_v32, %v69_v31  ;;  %vm76_vm3 = vweird.f32 %v115_v32 }
 0x12d   :  { %vm77_vm5 = vmor %vm75_vm4, %vm76_vm3 }
 0x12e   :  { %v72_v34 = vsub.f32 1.0, %v71_v33 }
 0x130   :  { %v73_v36 = vmul.f32 %v115_v32, %v72_v34 }
 0x132   :  { %v74_v38 = vadd.f32 %v115_v32, %v73_v36 }
 0x134   :  { %v78_v40 = vsel %vm77_vm5, %v115_v32, %v74_v38 }
 0x135   :  { %v83_v41 = vsel %vm80_vm6, %v82_v39, %v78_v40 }
 0x136   :  { %v88_v42 = vperm.slane %v83_v41, %v40_v8 }
 0x138   :  { %v90_v43 = vmul.f32 %v88_v42, %v43_v12 }
 0x13a   :  { %91 = vst [vmem:[#allocation5] sm:$0xff] %v90_v43 }
 0x13b   :  { %102 = dma.vmem_to_hbm [thread:$0]  %s98_s11, 128, %s100_s14, [#allocation4]  }
 0x13c   :  { %166 = dma.done.wait [#allocation4], 128  }
 0x13d   :  { %167 = vsyncadd [#allocation4], 4294967168 }
 0x13e   :  { %107 = vsyncpa [#allocation3], 1 }
 0x13f   :  { %108 = vsyncpa [#allocation4], 1 }

</bundles_post_ra>
